<compile_context>
chip_gen: v7x
topology: tpu7x:2x2x1
jax: 0.10.0
libtpu: 0.0.40
codegen_flags: <defaults>
</compile_context>

<pallas_src>
import functools

import numpy as np
import jax
import jax.numpy as jnp
from jax import lax
from jax.experimental import pallas as pl
from jax.experimental.pallas import tpu as pltpu

_HIGHEST = jax.lax.Precision.HIGHEST


# ----------------------------------------------------------------------------- helpers

@functools.lru_cache(maxsize=None)
def _roll_is_numpy_style():
    """One-time probe of pltpu.roll's shift direction so the halo math is convention-proof."""
    def k(x_ref, o_ref):
        o_ref[...] = pltpu.roll(x_ref[...], 1, axis=1)

    x = jnp.arange(128, dtype=jnp.float32).reshape(1, 128)
    y = pl.pallas_call(k, out_shape=jax.ShapeDtypeStruct((1, 128), jnp.float32))(x)
    return bool(float(y[0, 0]) == 127.0)  # True -> result[i] = x[(i - shift) % n] (np.roll)


def _shift_flat(x, delta, size, np_roll):
    """Circular shift so that result[..., q] = x[..., (q + delta) % size]; callers mask edges."""
    if delta % size == 0:
        return x
    amt = (-delta) % size if np_roll else delta % size
    return pltpu.roll(x, amt, axis=x.ndim - 1)


@functools.lru_cache(maxsize=None)
def _rowcol_index(H, W):
    """(2, H*W) int32 constant: row index and column index of every flattened pixel."""
    q = np.arange(H * W, dtype=np.int32)
    return jnp.asarray(np.stack([q // W, q % W], axis=0))


@functools.lru_cache(maxsize=None)
def _pool_select_matrix(H, W):
    """0/1 matrix (H*W, (H//2)*(W//2)) selecting the top-left anchor of every 2x2 pool window."""
    Ho, Wo = H // 2, W // 2
    q = np.arange(H * W)[:, None]
    qo = np.arange(Ho * Wo)[None, :]
    src = 2 * (qo // Wo) * W + 2 * (qo % Wo)
    return jnp.asarray((q == src).astype(np.float32))


# ----------------------------------------------------------------------------- conv kernel
# [optional MaxPool2d(2,2)] -> Conv2d(3x3, pad=1, implicit channel concat of inputs)
#                           -> [InstanceNorm2d] -> LeakyReLU / Tanh

def _conv_block_kernel(*refs, n_in, H, W, pooled, norm, act, slope, eps, np_roll):
    i = 0
    x_refs = refs[i:i + n_in]; i += n_in
    s_ref = None
    if pooled:
        s_ref = refs[i]; i += 1
    rc_ref = refs[i]; i += 1
    w_refs = refs[i:i + n_in]; i += n_in
    b_ref = refs[i]; i += 1
    o_ref = refs[i]

    HW = H * W
    Cout = o_ref.shape[1]

    # Per-input activations at conv resolution, (C_i, H*W), pixels on lanes.
    xs = []
    for k in range(n_in):
        x = x_refs[k][0].astype(jnp.float32)
        if pooled:
            Wi, HWi = 2 * W, 4 * HW
            m = jnp.maximum(x, _shift_flat(x, 1, HWi, np_roll))      # horizontal pair max
            m = jnp.maximum(m, _shift_flat(m, Wi, HWi, np_roll))     # vertical pair max
            # compact the 2x2 window anchors (HWi -> HW) with a 0/1 selection matmul (MXU)
            x = jnp.dot(m, s_ref[...], preferred_element_type=jnp.float32, precision=_HIGHEST)
        xs.append(x)

    rc = rc_ref[...]
    row = rc[0:1, :]
    col = rc[1:2, :]

    acc = jnp.zeros((Cout, HW), jnp.float32)
    for kh in range(3):
        for kw in range(3):
            dh, dw = kh - 1, kw - 1
            d = dh * W + dw
            if dh == 0 and dw == 0:
                ok = None
            else:
                ok = ((row + dh >= 0) & (row + dh < H) &
                      (col + dw >= 0) & (col + dw < W))
            for k in range(n_in):
                if ok is None:
                    xsh = xs[k]
                else:
                    xsh = jnp.where(ok, _shift_flat(xs[k], d, HW, np_roll), 0.0)
                wk = w_refs[k][kh * 3 + kw].astype(jnp.float32)       # (Cout, C_k)
                acc = acc + jnp.dot(wk, xsh, preferred_element_type=jnp.float32,
                                    precision=_HIGHEST)

    y = acc + b_ref[...].astype(jnp.float32)                          # (Cout, 1) bias broadcast

    if norm:  # InstanceNorm2d(affine=False): per-channel, biased variance over H*W lanes.
        mean = jnp.mean(y, axis=1, keepdims=True)
        var = jnp.mean((y - mean) * (y - mean), axis=1, keepdims=True)
        y = (y - mean) * lax.rsqrt(var + eps)

    if act == "leaky":
        y = jnp.where(y >= 0, y, slope * y)
    elif act == "tanh":
        y = jnp.tanh(y)

    o_ref[0] = y.astype(o_ref.dtype)


def conv_block(xs, weight, bias, *, H, W, pooled=False, norm=True, act="leaky",
               slope=0.2, eps=1e-5):
    """xs: list of (N, C_i, H_in*W_in) inputs (implicit channel concat; H_in = 2H if pooled).
    weight: (Cout, sum(C_i), 3, 3) PyTorch OIHW.  Returns (N, Cout, H*W)."""
    assert not (pooled and len(xs) != 1)
    N = xs[0].shape[0]
    c_in = [int(x.shape[1]) for x in xs]
    Cout = weight.shape[0]
    assert weight.shape == (Cout, sum(c_in), 3, 3)
    HW = H * W
    HW_in = 4 * HW if pooled else HW

    operands, in_specs = [], []
    for x, c in zip(xs, c_in):
        assert x.shape == (N, c, HW_in)
        operands.append(x)
        in_specs.append(pl.BlockSpec((1, c, HW_in), lambda n: (n, 0, 0)))
    if pooled:
        S = _pool_select_matrix(2 * H, 2 * W)
        operands.append(S)
        in_specs.append(pl.BlockSpec((HW_in, HW), lambda n: (0, 0)))
    operands.append(_rowcol_index(H, W))
    in_specs.append(pl.BlockSpec((2, HW), lambda n: (0, 0)))
    off = 0
    for c in c_in:
        w_k = jnp.transpose(weight[:, off:off + c], (2, 3, 0, 1)).reshape(9, Cout, c)
        operands.append(w_k)
        in_specs.append(pl.BlockSpec((9, Cout, c), lambda n: (0, 0, 0)))
        off += c
    operands.append(bias.reshape(Cout, 1).astype(jnp.float32))
    in_specs.append(pl.BlockSpec((Cout, 1), lambda n: (0, 0)))

    kernel = functools.partial(
        _conv_block_kernel, n_in=len(xs), H=H, W=W, pooled=pooled, norm=norm,
        act=act, slope=slope, eps=eps, np_roll=_roll_is_numpy_style())

    return pl.pallas_call(
        kernel,
        out_shape=jax.ShapeDtypeStruct((N, Cout, HW), xs[0].dtype),
        grid=(N,),
        in_specs=in_specs,
        out_specs=pl.BlockSpec((1, Cout, HW), lambda n: (n, 0, 0)),
        compiler_params=pltpu.CompilerParams(dimension_semantics=("parallel",)),
    )(*operands)


# ----------------------------------------------------------------------------- up-sampling kernel
# ConvTranspose2d(k=4, s=2, p=1) + InstanceNorm2d + LeakyReLU(0.2)
# Decomposed into the four output-parity planes; each plane is a 2x2-tap conv of the input.
# (kernel tap, spatial offset) pairs contributing to even / odd output indices:
_PARITY_TAPS = (((1, 0), (3, -1)),   # output index even
                ((0, 1), (2, 0)))    # output index odd


def _up_block_kernel(x_ref, rc_ref, w_ref, b_ref, o_ref, *, H, W, slope, eps, np_roll):
    HW = H * W
    Cout = o_ref.shape[2]
    x = x_ref[0].astype(jnp.float32)

    rc = rc_ref[...]
    row = rc[0:1, :]
    col = rc[1:2, :]

    planes = []
    for pi in range(2):
        for pj in range(2):
            acc = jnp.zeros((Cout, HW), jnp.float32)
            for r, (_, dh) in enumerate(_PARITY_TAPS[pi]):
                for c, (_, dw) in enumerate(_PARITY_TAPS[pj]):
                    d = dh * W + dw
                    if dh == 0 and dw == 0:
                        xsh = x
                    else:
                        ok = ((row + dh >= 0) & (row + dh < H) &
                              (col + dw >= 0) & (col + dw < W))
                        xsh = jnp.where(ok, _shift_flat(x, d, HW, np_roll), 0.0)
                    wk = w_ref[pi * 2 + pj, r * 2 + c].astype(jnp.float32)   # (Cout, Cin)
                    acc = acc + jnp.dot(wk, xsh, preferred_element_type=jnp.float32,
                                        precision=_HIGHEST)
            planes.append(acc + b_ref[...].astype(jnp.float32))

    # InstanceNorm over the full (2H x 2W) output = all four parity planes jointly.
    inv_n = 1.0 / (4.0 * HW)
    mean = sum(jnp.sum(p, axis=1, keepdims=True) for p in planes) * inv_n
    var = sum(jnp.sum((p - mean) * (p - mean), axis=1, keepdims=True) for p in planes) * inv_n
    inv_std = lax.rsqrt(var + eps)
    for p_idx in range(4):
        yp = (planes[p_idx] - mean) * inv_std
        yp = jnp.where(yp >= 0, yp, slope * yp)
        o_ref[0, p_idx] = yp.astype(o_ref.dtype)


def _prep_convT_weight(weight):
    """(Cin, Cout, 4, 4) ConvTranspose2d weight -> (4, 4, Cout, Cin) parity/tap slices."""
    planes = []
    for pi in range(2):
        for pj in range(2):
            taps = [jnp.transpose(weight[:, :, kh, kw], (1, 0))
                    for kh, _ in _PARITY_TAPS[pi] for kw, _ in _PARITY_TAPS[pj]]
            planes.append(jnp.stack(taps, axis=0))
    return jnp.stack(planes, axis=0)


def upsample_block(x, weight, bias, *, H, W, slope=0.2, eps=1e-5):
    """x: (N, Cin, H*W) -> (N, Cout, 4*H*W) at spatial (2H, 2W)."""
    N, Cin, HW = x.shape
    assert HW == H * W
    Cout = weight.shape[1]
    w_par = _prep_convT_weight(weight)
    kernel = functools.partial(_up_block_kernel, H=H, W=W, slope=slope, eps=eps,
                               np_roll=_roll_is_numpy_style())
    y = pl.pallas_call(
        kernel,
        out_shape=jax.ShapeDtypeStruct((N, 4, Cout, HW), x.dtype),
        grid=(N,),
        in_specs=[pl.BlockSpec((1, Cin, HW), lambda n: (n, 0, 0)),
                  pl.BlockSpec((2, HW), lambda n: (0, 0)),
                  pl.BlockSpec((4, 4, Cout, Cin), lambda n: (0, 0, 0, 0)),
                  pl.BlockSpec((Cout, 1), lambda n: (0, 0))],
        out_specs=pl.BlockSpec((1, 4, Cout, HW), lambda n: (n, 0, 0, 0)),
        compiler_params=pltpu.CompilerParams(dimension_semantics=("parallel",)),
    )(x, _rowcol_index(H, W), w_par, bias.reshape(Cout, 1).astype(jnp.float32))

    # Interleave the parity planes: (N,4,Cout,HW) -> (N,Cout,2H,2W) -> (N,Cout,4*HW).
    # TODO(synk): a parity-aware consumer kernel could remove this single XLA transpose.
    y = y.reshape(N, 2, 2, Cout, H, W)
    y = jnp.transpose(y, (0, 3, 4, 1, 5, 2)).reshape(N, Cout, 4 * HW)
    return y


# ----------------------------------------------------------------------------- full forward

def unet_maxpool_forward(x, params):
    """x: (N, in_channels, H, W) NCHW.  Returns the module's 6 outputs (NCHW)."""
    N, C0, H0, W0 = x.shape
    assert H0 % 16 == 0 and W0 % 16 == 0
    xf = x.reshape(N, C0, H0 * W0)
    p = params

    # Encoder (MaxPool2d(2,2) fused into the following conv kernel).
    d1 = conv_block([xf], p["down1_w"], p["down1_b"], H=H0, W=W0)
    d2 = conv_block([d1], p["down2_w"], p["down2_b"], H=H0 // 2, W=W0 // 2, pooled=True)
    d3 = conv_block([d2], p["down3_w"], p["down3_b"], H=H0 // 4, W=W0 // 4, pooled=True)
    d4 = conv_block([d3], p["down4_w"], p["down4_b"], H=H0 // 8, W=W0 // 8, pooled=True)
    bott = conv_block([d4], p["bott_w"], p["bott_b"], H=H0 // 16, W=W0 // 16, pooled=True,
                      slope=0.01)  # nn.LeakyReLU() default slope in the bottleneck

    # Decoder (skip concatenation folded into the conv kernels as channel blocks).
    u1 = upsample_block(bott, p["up1_w"], p["up1_b"], H=H0 // 16, W=W0 // 16)
    c1 = conv_block([u1, d4], p["upconv1_w"], p["upconv1_b"], H=H0 // 8, W=W0 // 8)
    u2 = upsample_block(c1, p["up2_w"], p["up2_b"], H=H0 // 8, W=W0 // 8)
    c2 = conv_block([u2, d3], p["upconv2_w"], p["upconv2_b"], H=H0 // 4, W=W0 // 4)
    u3 = upsample_block(c2, p["up3_w"], p["up3_b"], H=H0 // 4, W=W0 // 4)
    c3 = conv_block([u3, d2], p["upconv3_w"], p["upconv3_b"], H=H0 // 2, W=W0 // 2)
    u4 = upsample_block(c3, p["up4_w"], p["up4_b"], H=H0 // 2, W=W0 // 2)
    c4 = conv_block([u4, d1], p["upconv4_w"], p["upconv4_b"], H=H0, W=W0)
    out = conv_block([c4], p["final_w"], p["final_b"], H=H0, W=W0, norm=False, act="tanh")

    def nchw(t, h, w):
        return t.reshape(N, t.shape[1], h, w)

    return (nchw(bott, H0 // 16, W0 // 16), nchw(c1, H0 // 8, W0 // 8),
            nchw(c2, H0 // 4, W0 // 4), nchw(c3, H0 // 2, W0 // 2),
            nchw(c4, H0, W0), nchw(out, H0, W0))


# ----------------------------------------------------------------------------- pure-JAX reference

def _conv_ref(x, w, b):
    y = lax.conv_general_dilated(x, w, (1, 1), ((1, 1), (1, 1)),
                                 dimension_numbers=("NCHW", "OIHW", "NCHW"),
                                 precision=_HIGHEST)
    return y + b[None, :, None, None]


def _convT_ref(x, w, b):
    wt = jnp.transpose(w, (1, 0, 2, 3))[:, :, ::-1, ::-1]
    y = lax.conv_general_dilated(x, wt, (1, 1), ((2, 2), (2, 2)), lhs_dilation=(2, 2),
                                 dimension_numbers=("NCHW", "OIHW", "NCHW"),
                                 precision=_HIGHEST)
    return y + b[None, :, None, None]


def _inorm_ref(y, eps=1e-5):
    mean = y.mean(axis=(2, 3), keepdims=True)
    var = ((y - mean) ** 2).mean(axis=(2, 3), keepdims=True)
    return (y - mean) * lax.rsqrt(var + eps)


def _pool_ref(x):
    return lax.reduce_window(x, -jnp.inf, lax.max, (1, 1, 2, 2), (1, 1, 2, 2), "VALID")


def _leaky(y, s):
    return jnp.where(y >= 0, y, s * y)


def _reference_forward(x, p):
    cb = lambda t, w, b, s=0.2: _leaky(_inorm_ref(_conv_ref(t, w, b)), s)
    ub = lambda t, w, b: _leaky(_inorm_ref(_convT_ref(t, w, b)), 0.2)
    d1 = cb(x, p["down1_w"], p["down1_b"])
    d2 = cb(_pool_ref(d1), p["down2_w"], p["down2_b"])
    d3 = cb(_pool_ref(d2), p["down3_w"], p["down3_b"])
    d4 = cb(_pool_ref(d3), p["down4_w"], p["down4_b"])
    bott = cb(_pool_ref(d4), p["bott_w"], p["bott_b"], s=0.01)
    c1 = cb(jnp.concatenate([ub(bott, p["up1_w"], p["up1_b"]), d4], 1), p["upconv1_w"], p["upconv1_b"])
    c2 = cb(jnp.concatenate([ub(c1, p["up2_w"], p["up2_b"]), d3], 1), p["upconv2_w"], p["upconv2_b"])
    c3 = cb(jnp.concatenate([ub(c2, p["up3_w"], p["up3_b"]), d2], 1), p["upconv3_w"], p["upconv3_b"])
    c4 = cb(jnp.concatenate([ub(c3, p["up4_w"], p["up4_b"]), d1], 1), p["upconv4_w"], p["upconv4_b"])
    out = jnp.tanh(_conv_ref(c4, p["final_w"], p["final_b"]))
    return bott, c1, c2, c3, c4, out


# ----------------------------------------------------------------------------- params / main

def _init_params(key, in_ch, ngf, out_ch):
    f = ngf
    conv_specs = [("down1", f, in_ch), ("down2", 2 * f, f), ("down3", 4 * f, 2 * f),
                  ("down4", 8 * f, 4 * f), ("bott", 8 * f, 8 * f),
                  ("upconv1", 8 * f, 16 * f), ("upconv2", 4 * f, 8 * f),
                  ("upconv3", 2 * f, 4 * f), ("upconv4", f, 2 * f), ("final", out_ch, f)]
    convT_specs = [("up1", 8 * f, 8 * f), ("up2", 8 * f, 4 * f),
                   ("up3", 4 * f, 2 * f), ("up4", 2 * f, f)]
    keys = iter(jax.random.split(key, 2 * (len(conv_specs) + len(convT_specs))))
    params = {}
    for name, co, ci in conv_specs:
        params[name + "_w"] = 0.15 * jax.random.normal(next(keys), (co, ci, 3, 3), jnp.float32)
        params[name + "_b"] = 0.05 * jax.random.normal(next(keys), (co,), jnp.float32)
    for name, ci, co in convT_specs:
        params[name + "_w"] = 0.15 * jax.random.normal(next(keys), (ci, co, 4, 4), jnp.float32)
        params[name + "_b"] = 0.05 * jax.random.normal(next(keys), (co,), jnp.float32)
    return params


if __name__ == "__main__":
    N, in_ch, H, W = 2, 3, 32, 32
    ngf, out_ch = 8, 3

    key = jax.random.PRNGKey(0)
    kx, kp = jax.random.split(key)
    x = jax.random.normal(kx, (N, in_ch, H, W), jnp.float32)
    params = _init_params(kp, in_ch, ngf, out_ch)

    _roll_is_numpy_style()  # warm the one-time roll-semantics probe outside of jit tracing

    fwd = jax.jit(unet_maxpool_forward)
    outs = jax.block_until_ready(fwd(x, params))

    refs = jax.block_until_ready(_reference_forward(x, params))
    names = ("bottleneck", "upconv1", "upconv2", "upconv3", "upconv4", "final")
    for name, o, r in zip(names, outs, refs):
        assert o.shape == r.shape, (name, o.shape, r.shape)
        err = float(jnp.max(jnp.abs(o - r)))
        assert err < 5e-3, (name, err)

    print("KERNEL_OK")
</pallas_src>

<mosaic_0001>
module attributes {stable_mosaic.version = 11 : i64} {
  func.func @k(%arg0: memref<1x128xf32, #tpu.memory_space<vmem>>, %arg1: memref<1x128xf32, #tpu.memory_space<vmem>>) attributes {dimension_semantics = [], scalar_prefetch = 0 : i64, scratch_operands = 0 : i64, tpu.core_type = #tpu.core_type<tc>} {
    %c0 = arith.constant 0 : index
    %c0_0 = arith.constant 0 : index
    %0 = vector.load %arg0[%c0, %c0_0] : memref<1x128xf32, #tpu.memory_space<vmem>>, vector<1x128xf32>
    %c1_i32 = arith.constant 1 : i32
    %1 = tpu.dynamic_rotate %0 by %c1_i32 dim 1 : vector<1x128xf32>, i32 -> vector<1x128xf32>
    %c0_1 = arith.constant 0 : index
    %c0_2 = arith.constant 0 : index
    %2 = vector.load %arg1[%c0_1, %c0_2] : memref<1x128xf32, #tpu.memory_space<vmem>>, vector<1x128xf32>
    tpu.vector_store %arg1[%c0_1, %c0_2], %1 {strides = array<i32>} : memref<1x128xf32, #tpu.memory_space<vmem>>, vector<1x128xf32>,
    return
  }
}

</mosaic_0001>

<bundles_post_ra>
// kernel: tpu_custom_call.1
= control target key start
LH: loop header
LB: loop body
LE: loop exit
PB: predicated region body
PF: predicated region fallthrough
CT: control target
= control target key end

     0   :  { %6 = vsyncpa [#allocation3], 0  ;;  %s128_s0 = inlined_call_operand.hbm [shape: f32[1,128], index: 0, kind: input, shape index: {}]   ;;  %s129_s1 = inlined_call_operand.hbm [shape: f32[1,128], index: 1, kind: output, shape index: {}]  }
   0x1   :  { %7 = vsyncpa [#allocation4], 0  ;;  %s91_s6 = smov [#allocation2]   ;;  %s43_s10 = scalar_lea.hbm %s128_s0, 16 }
   0x2   :  { %s14_s7 = sshll.u32 %s91_s6, 4  ;;  %p44_p0 = scmp.ne.s32.totalorder %s128_s0, %s43_s10  ;;  %s15_s7 = int_to_ptr.vmem [resolvable:$true] %s14_s7 }
   0x3   :  { %p47_p1 = scmp.lt.u32.totalorder %s43_s10, %s128_s0 }
   0x5   :  { %p49_p2 = pnand %p47_p1, %p44_p0 }
   0x7   :  { %52 = shalt.err (!%p49_p2)
}
   0x8   :  { %s53_s15 = scalar_lea.vmem %s15_s7, 16  ;;  %s57_s16 = scalar_lea.vmem %s15_s7, 32 }
   0x9   :  { %p54_p3 = scmp.ne.s32.totalorder %s15_s7, %s53_s15  ;;  %p58_p4 = scmp.lt.s32.totalorder %s15_s7, %s15_s7 }
   0xa   :  { %p59_p5 = scmp.lt.s32.totalorder %s57_s16, %s53_s15 }
   0xc   :  { %p60_p6 = por %p59_p5, %p58_p4 }
   0xe   :  { %p61_p7 = pnand %p60_p6, %p54_p3 }
  0x10   :  { %64 = shalt.err (!%p61_p7)
}
  0x11   :  { %17 = dma.hbm_to_vmem [thread:$0]  %s128_s0, 16, %s15_s7, [#allocation3]  }
  0x12   :  { %87 = dma.done.wait [#allocation3], 16  }
  0x13   :  { %88 = vsyncadd [#allocation3], 4294967280  ;;  %v21_v0 = vld [vmem:[#allocation2] sm:$0x1]  ;;  %s92_s19 = smov 1   ;;  %s93_s20 = smov [#allocation5]  }
  0x14   :  { %22 = vrot.lane.b32.xlu0 %v21_v0, %s92_s19  ;;  %s31_s21 = sshll.u32 %s93_s20, 4  ;;  %s32_s21 = int_to_ptr.vmem [resolvable:$true] %s31_s21 }
  0x15   :  { %s65_s22 = scalar_lea.vmem %s32_s21, 16  ;;  %s69_s23 = scalar_lea.vmem %s32_s21, 32 }
  0x16   :  { %p66_p8 = scmp.ne.s32.totalorder %s32_s21, %s65_s22  ;;  %p70_p9 = scmp.lt.s32.totalorder %s32_s21, %s32_s21 }
  0x17   :  { %p71_p10 = scmp.lt.s32.totalorder %s69_s23, %s65_s22 }
  0x19   :  { %p72_p11 = por %p71_p10, %p70_p9 }
  0x1b   :  { %p73_p12 = pnand %p72_p11, %p66_p8 }
  0x86   :  { %v23_v1 = vpop.permute.xlu0 %22 }
  0x87   :  { %24 = vst [vmem:[#allocation5] sm:$0x1] %v23_v1 }
  0x88   :  { %76 = shalt.err (!%p73_p12)
}
  0x89   :  { %s77_s25 = scalar_lea.hbm %s129_s1, 16 }
  0x8a   :  { %p78_p13 = scmp.ne.s32.totalorder %s129_s1, %s77_s25  ;;  %p81_p0 = scmp.lt.u32.totalorder %s77_s25, %s129_s1 }
  0x8c   :  { %p83_p1 = pnand %p81_p0, %p78_p13 }
  0x8e   :  { %86 = shalt.err (!%p83_p1)
}
  0x8f   :  { %34 = dma.vmem_to_hbm [thread:$0]  %s32_s21, 16, %s129_s1, [#allocation4]  }
  0x90   :  { %89 = dma.done.wait [#allocation4], 16  }
  0x91   :  { %90 = vsyncadd [#allocation4], 4294967280 }
  0x92   :  { %38 = vsyncpa [#allocation3], 1 }
  0x93   :  { %39 = vsyncpa [#allocation4], 1 }

</bundles_post_ra>
